<compile_context>
chip_gen: v5e
topology: v5e:2x2
jax: 0.10.0
libtpu: 0.0.40
codegen_flags: <defaults>
</compile_context>

<pallas_src>
import math
from functools import partial

import jax
import jax.numpy as jnp
from jax import lax
from jax.experimental import pallas as pl
from jax.experimental.pallas import tpu as pltpu


_MIN_PARALLEL_STEPS = 4  # give v7x's 2 TensorCores >=2 steps each when possible


# --------------------------------------------------------------------------
# Kernels
# --------------------------------------------------------------------------
def _pixel_norm_kernel_channels(x_ref, o_ref, *, eps, scale):
    # x_ref/o_ref: (tile_pre, C, tile_post) in VMEM. Reduce over the channel
    # (sublane) axis; the spatial axis stays lane-dense for unmasked stores.
    x = x_ref[...]
    xf = x.astype(jnp.float32)
    ss = jnp.sum(xf * xf, axis=-2, keepdims=True)            # (tile_pre,1,tile_post)
    inv = scale * lax.rsqrt(jnp.maximum(ss, eps * eps))       # EUP rsqrt, no divide
    # Rescale in the input dtype: avoids a block-sized f32 temp for bf16/int8;
    # exact (same as before) for f32 inputs.
    o_ref[...] = (x * inv.astype(x.dtype)).astype(o_ref.dtype)


def _pixel_norm_kernel_last(x_ref, o_ref, *, eps, scale):
    # Fallback when the normalized axis is the last axis.
    # x_ref/o_ref: (tile_rows, C) in VMEM; reduce over lanes.
    x = x_ref[...]
    xf = x.astype(jnp.float32)
    ss = jnp.sum(xf * xf, axis=-1, keepdims=True)             # (tile_rows, 1)
    inv = scale * lax.rsqrt(jnp.maximum(ss, eps * eps))
    o_ref[...] = (x * inv.astype(x.dtype)).astype(o_ref.dtype)


# --------------------------------------------------------------------------
# Sizing helpers
# --------------------------------------------------------------------------
def _cdiv(a, b):
    return -(-a // b)


def _round_up(a, m):
    return _cdiv(a, m) * m


def _vmem_plan():
    """Generation-aware (target block bytes, vmem_limit_bytes)."""
    vmem = 128 << 20
    try:
        info = pltpu.get_tpu_info()
        vmem = int(getattr(info, "vmem_capacity_bytes", vmem))
    except Exception:
        pass
    if vmem <= (64 << 20):                       # v7x-class: 64 MiB per TC
        limit = min(48 << 20, (vmem * 3) // 4)
        return 4 << 20, limit
    return 8 << 20, 64 << 20                     # v5e / v6e: 128 MiB physical


def _padded_sublane_count(n, itemsize):
    """VMEM (8,128) tiling pads the sublane dim: 8 (f32), 16 (bf16), 32 (i8)."""
    pack = max(8, 32 // max(itemsize, 1))
    return _round_up(n, pack)


def _plan_channels_tiles(pre, post, row_bytes, target_bytes):
    """row_bytes = padded-C * itemsize (per lane column). Returns (tile_pre, tile_post)."""
    lanes_budget = max(128, (target_bytes // max(row_bytes, 1)) // 128 * 128)
    if post > lanes_budget:
        # Many lane tiles already -> plenty of grid steps; one pre row per step.
        return 1, lanes_budget
    # Whole post fits in one block: keep the DMA fully contiguous, block over pre.
    block_bytes = max(post * row_bytes, 1)
    tile_pre = max(1, min(pre, target_bytes // block_bytes))
    if _cdiv(pre, tile_pre) >= _MIN_PARALLEL_STEPS:
        return tile_pre, post
    # Expose more parallel steps by shrinking tile_pre first (stays contiguous).
    if pre >= _MIN_PARALLEL_STEPS:
        return max(1, pre // _MIN_PARALLEL_STEPS), post
    # pre too small: split post into multiple-of-128 lane tiles if possible.
    if post >= 256:
        want_post_steps = _cdiv(_MIN_PARALLEL_STEPS, pre)
        k = max(1, post // (128 * want_post_steps))
        return 1, 128 * k
    return 1, post


def _plan_rows_tile(rows, row_bytes, target_bytes):
    """row_bytes = lane-padded C * itemsize. Returns tile_rows (multiple of 8)."""
    if rows <= 8:
        return rows
    budget_rows = max(8, (target_bytes // max(row_bytes, 1)) // 8 * 8)
    tile_rows = min(rows, budget_rows)
    if _cdiv(rows, tile_rows) < _MIN_PARALLEL_STEPS and rows > 8:
        splits = min(_MIN_PARALLEL_STEPS, rows // 8)
        tile_rows = max(8, (rows // splits) // 8 * 8)
    return tile_rows


# --------------------------------------------------------------------------
# Wrapper
# --------------------------------------------------------------------------
def pixel_norm(x, dim=1, eps=1e-4):
    """PixelNorm forward. x: any-rank array, normalized along `dim`."""
    dim = dim % x.ndim
    c = x.shape[dim]
    scale = float(math.sqrt(c))
    eps = float(eps)
    itemsize = jnp.dtype(x.dtype).itemsize
    target_bytes, vmem_limit = _vmem_plan()

    pre = math.prod(x.shape[:dim]) if dim > 0 else 1
    post = math.prod(x.shape[dim + 1:]) if dim < x.ndim - 1 else 1

    if post > 1:
        # (pre, C, post): channel fully resident per block (reduced on sublanes),
        # spatial axis lane-dense. Pure reshape — no transpose HBM passes.
        x3 = x.reshape(pre, c, post)
        row_bytes = _padded_sublane_count(c, itemsize) * itemsize
        tile_pre, tile_post = _plan_channels_tiles(pre, post, row_bytes, target_bytes)
        grid = (_cdiv(pre, tile_pre), _cdiv(post, tile_post))

        out3 = pl.pallas_call(
            partial(_pixel_norm_kernel_channels, eps=eps, scale=scale),
            out_shape=jax.ShapeDtypeStruct((pre, c, post), x.dtype),
            grid_spec=pltpu.PrefetchScalarGridSpec(
                num_scalar_prefetch=0,
                grid=grid,
                in_specs=[pl.BlockSpec((tile_pre, c, tile_post),
                                       lambda i, j: (i, 0, j))],
                out_specs=pl.BlockSpec((tile_pre, c, tile_post),
                                       lambda i, j: (i, 0, j)),
            ),
            compiler_params=pltpu.CompilerParams(
                dimension_semantics=("parallel", "parallel"),
                vmem_limit_bytes=vmem_limit),
        )(x3)
        return out3.reshape(x.shape)

    # Normalized axis is the last axis: (rows, C) layout, C on lanes.
    rows = pre
    x2 = x.reshape(rows, c)
    row_bytes = _round_up(c, 128) * itemsize     # lane-padded width per row
    tile_rows = _plan_rows_tile(rows, row_bytes, target_bytes)
    grid = (_cdiv(rows, tile_rows),)

    out2 = pl.pallas_call(
        partial(_pixel_norm_kernel_last, eps=eps, scale=scale),
        out_shape=jax.ShapeDtypeStruct((rows, c), x.dtype),
        grid_spec=pltpu.PrefetchScalarGridSpec(
            num_scalar_prefetch=0,
            grid=grid,
            in_specs=[pl.BlockSpec((tile_rows, c), lambda i: (i, 0))],
            out_specs=pl.BlockSpec((tile_rows, c), lambda i: (i, 0)),
        ),
        compiler_params=pltpu.CompilerParams(
            dimension_semantics=("parallel",),
            vmem_limit_bytes=vmem_limit),
    )(x2)
    return out2.reshape(x.shape)


# --------------------------------------------------------------------------
# Pure-JAX reference (mirrors torch.nn.functional.normalize semantics)
# --------------------------------------------------------------------------
def _pixel_norm_ref(x, dim=1, eps=1e-4):
    norm = jnp.sqrt(jnp.sum(jnp.square(x.astype(jnp.float32)), axis=dim, keepdims=True))
    denom = jnp.maximum(norm, eps)
    return (x.astype(jnp.float32) / denom * math.sqrt(x.shape[dim])).astype(x.dtype)


if __name__ == "__main__":
    key = jax.random.PRNGKey(0)
    k0, k1 = jax.random.split(key)

    # NCHW input, normalize over the channel dim (dim=1), as used in mp_lumiere.
    x = jax.random.normal(k0, (2, 4, 16, 16), dtype=jnp.float32)
    out = jax.block_until_ready(pixel_norm(x, dim=1, eps=1e-4))
    ref = _pixel_norm_ref(x, dim=1, eps=1e-4)
    assert out.shape == x.shape and out.dtype == x.dtype
    assert jnp.allclose(out, ref, atol=1e-4, rtol=1e-4), "f32 NCHW mismatch vs reference"

    # Last-axis path (dim=-1), f32.
    y = jax.random.normal(k1, (8, 32), dtype=jnp.float32)
    out_y = jax.block_until_ready(pixel_norm(y, dim=-1, eps=1e-4))
    ref_y = _pixel_norm_ref(y, dim=-1, eps=1e-4)
    assert jnp.allclose(out_y, ref_y, atol=1e-4, rtol=1e-4), "last-axis mismatch vs reference"

    # bf16 NCHW (exercises the in-dtype rescale path; ~1-ulp bf16 differences expected).
    xb = x.astype(jnp.bfloat16)
    out_b = jax.block_until_ready(pixel_norm(xb, dim=1, eps=1e-4))
    ref_b = _pixel_norm_ref(xb, dim=1, eps=1e-4)
    assert jnp.allclose(out_b.astype(jnp.float32), ref_b.astype(jnp.float32),
                        atol=5e-2, rtol=5e-2), "bf16 mismatch vs reference"

    print("KERNEL_OK")
</pallas_src>

<mosaic_0001>
module attributes {stable_mosaic.version = 11 : i64} {
  func.func @_pixel_norm_kernel_channels(%arg0: i32, %arg1: i32, %arg2: memref<1x4x128xf32, #tpu.memory_space<vmem>>, %arg3: memref<1x4x128xf32, #tpu.memory_space<vmem>>) attributes {dimension_semantics = [#tpu.dimension_semantics<parallel>, #tpu.dimension_semantics<parallel>], iteration_bounds = array<i64: 2, 2>, scalar_prefetch = 0 : i64, scratch_operands = 0 : i64, tpu.core_type = #tpu.core_type<tc>, window_params = [{transform_indices = @transform_0, window_bounds = array<i64: 1, 4, 128>}, {transform_indices = @transform_1, window_bounds = array<i64: 1, 4, 128>}]} {
    %c0 = arith.constant 0 : index
    %c0_0 = arith.constant 0 : index
    %c0_1 = arith.constant 0 : index
    %0 = vector.load %arg2[%c0, %c0_0, %c0_1] : memref<1x4x128xf32, #tpu.memory_space<vmem>>, vector<1x4x128xf32>
    %1 = arith.mulf %0, %0 : vector<1x4x128xf32>
    %cst = arith.constant dense<0.000000e+00> : vector<1x128xf32>
    %2 = vector.multi_reduction <add>, %1, %cst [1] : vector<1x4x128xf32> to vector<1x128xf32>
    %3 = vector.shape_cast %2 : vector<1x128xf32> to vector<1x1x128xf32>
    %cst_2 = arith.constant 9.99999993E-9 : f32
    %4 = vector.broadcast %cst_2 : f32 to vector<1x1x128xf32>
    %5 = arith.maximumf %3, %4 : vector<1x1x128xf32>
    %6 = math.rsqrt %5 : vector<1x1x128xf32>
    %cst_3 = arith.constant 2.000000e+00 : f32
    %7 = vector.broadcast %cst_3 : f32 to vector<1x1x128xf32>
    %8 = arith.mulf %7, %6 : vector<1x1x128xf32>
    %9 = vector.broadcast %8 : vector<1x1x128xf32> to vector<1x4x128xf32>
    %10 = arith.mulf %0, %9 : vector<1x4x128xf32>
    %c0_4 = arith.constant 0 : index
    %c0_5 = arith.constant 0 : index
    %c0_6 = arith.constant 0 : index
    %11 = vector.load %arg3[%c0_4, %c0_5, %c0_6] : memref<1x4x128xf32, #tpu.memory_space<vmem>>, vector<1x4x128xf32>
    tpu.vector_store %arg3[%c0_4, %c0_5, %c0_6], %10 {strides = array<i32>} : memref<1x4x128xf32, #tpu.memory_space<vmem>>, vector<1x4x128xf32>,
    return
  }
  func.func @transform_0(%arg0: i32, %arg1: i32) -> (i32, i32, i32) {
    %c0_i32 = arith.constant 0 : i32
    %c0_i32_0 = arith.constant 0 : i32
    return %arg0, %c0_i32, %arg1 : i32, i32, i32
  }
  func.func @transform_1(%arg0: i32, %arg1: i32) -> (i32, i32, i32) {
    %c0_i32 = arith.constant 0 : i32
    %c0_i32_0 = arith.constant 0 : i32
    return %arg0, %c0_i32, %arg1 : i32, i32, i32
  }
}

</mosaic_0001>

<bundles_post_ra>
// kernel: tpu_custom_call.1
= control target key start
LH: loop header
LB: loop body
LE: loop exit
PB: predicated region body
PF: predicated region fallthrough
CT: control target
= control target key end

     0   :  { %6 = vsyncpa [#allocation3], 0  ;;  %s660_s0 = inlined_call_operand.hbm [shape: f32[2,4,256], index: 0, kind: input, shape index: {}]   ;;  %s661_s1 = inlined_call_operand.hbm [shape: f32[2,4,256], index: 1, kind: output, shape index: {}]  }
   0x1   :  { %8 = vsyncpa [#allocation3 + $0x1], 0 }
   0x2   :  { %9 = vsyncpa [#allocation4], 0 }
   0x3   :  { %11 = vsyncpa [#allocation4 + $0x1], 0  ;;  %s514_s6 = smov 0   ;;  %s516_s7 = smov 0  }
   0x4   :  { %s518_s8 = smov 0   ;;  %s520_s9 = smov 0  }
   0x5   :  { %s522_s10 = smov 0   ;;  %s524_s11 = smov 0  }
   0x6   :  { %s526_s12 = smov 0   ;;  %s528_s13 = smov 0  }
   0x7 LB: > { %s279_s14 = sadd.s32 4294967295, %s502_s13   ;;  %s280_s15 = sadd.s32 4294967294, %s502_s13   ;;  %s502_s13 = sphi %s528_s13, %s17_s13   ;;  %s498_s12 = sphi %s526_s12, %s672_s12   ;;  %s494_s11 = sphi %s524_s11, %s671_s11   ;;  %s490_s10 = sphi %s522_s10, %s670_s10   ;;  %s486_s9 = sphi %s520_s9, %s669_s9   ;;  %s482_s8 = sphi %s518_s8, %s668_s8   ;;  %s478_s7 = sphi %s516_s7, %s667_s7   ;;  %s474_s6 = sphi %s514_s6, %s666_s6  }
   0x8   : > { %s26_s16 = sadd.s32 1, %s494_s11  ;;  %s29_s17 = sadd.s32 1, %s498_s12 }
   0x9   : > { %p27_p0 = scmp.ge.s32.totalorder %s26_s16, 2  ;;  %s38_s18 = sadd.s32 1, %s482_s8 }
   0xa   : > { %p45_p1 = scmp.ne.s32.totalorder %s482_s8, %s478_s7  ;;  %p46_p2 = scmp.eq.s32.totalorder %s502_s13, 0 }
   0xb   : > { %s674_s16 = smov (%p27_p0, %s26_s16), 0  ;;  %s676_s17 = smov (!%p27_p0, %s29_s17), %s498_s12 }
   0xc   : > { %s34_s19 = ssub.s32 %s494_s11, %s674_s16  ;;  %p567_p3 = por %p46_p2, %p45_p1 }
   0xd   : > { %p31_p4 = scmp.ge.s32.totalorder %s676_s17, 2  ;;  %p51_p5 = scmp.ne.s32.totalorder %s478_s7, %s474_s6 }
   0xe   : > { %p52_p6 = scmp.eq.s32.totalorder %s279_s14, 0  ;;  %p77_p7 = scmp.eq.s32.totalorder %s279_s14, 3 }
   0xf   : > { %s678_s17 = smov (%p31_p4, %s676_s17), 0  ;;  %p83_p10 = scmp.eq.s32.totalorder %s280_s15, 3 }
  0x10   : > { %p575_p8 = por %p52_p6, %p51_p5  ;;  %p579_p9 = por %p77_p7, %p45_p1 }
  0x11   : > { %s33_s23 = ssub.s32 %s498_s12, %s678_s17  ;;  %p585_p12 = por %p83_p10, %p51_p5 }
  0x12   : > { %s35_s24 = sor.u32 %s34_s19, %s33_s23  ;;  %p306_p13 = scmp.lt.s32.totalorder %s502_s13, 4 }
  0x13   : > { %p36_p11 = scmp.eq.s32.totalorder %s35_s24, 0  ;;  %s103_s26 = sand.u32 1, %s482_s8  }
  0x14   : > { %s283_s28 = sshll.u32 %s103_s26, 2  ;;  %s284_s29 = sshll.u32 %s498_s12, 1 }
  0x15   : > { %s592_s27 = scalar_select %p36_p11, %s482_s8, %s38_s18  }
  0x16   : > { %s111_s30 = sadd.s32 %s494_s11, %s284_s29  ;;  %s107_s2 = scalar_lea.vmem [#allocation2], %s283_s28 }
  0x17   : > { %s117_s3 = sshll.u32 %s107_s2, 4  ;;  %s285_s4 = sshll.u32 %s111_s30, 2  ;;  %s118_s3 = int_to_ptr.vmem [resolvable:$true] %s117_s3 }
  0x18   : > { %s113_s15 = scalar_lea.hbm %s660_s0, %s285_s4  ;;  %p299_p0 = pnand %p306_p13, %p567_p3 }
  0x19   : > { %s115_s19 = sshll.u32 %s113_s15, 4  ;;  %p286_p1 = scmp.ge.s32.totalorder %s502_s13, 1  ;;  %s116_s19 = int_to_ptr.hbm [resolvable:$true] %s115_s19 }
  0x1a   : > { %s104_s23 = scalar_lea.sflag [#allocation3], %s103_s26  ;;  %p122_p2 = scmp.lt.s32.totalorder %s502_s13, 5 }
  0x1b   : > { %301 = dma.hbm_to_vmem [thread:$0]  (!%p299_p0), %s116_s19, 64, %s118_s3, %s104_s23  }
  0x1c   : > { %p123_p4 = pnand %p286_p1, %p122_p2 }
  0x1d   : > { %s604_s18 = sand.u32 (!%p123_p4), 1, %s478_s7  }
  0x1e   : > { %126 = sbr.rel (%p123_p4) target bundleno = 79 (0x4f), region = 24  ;;  %s287_s24 = sshll.u32 (!%p123_p4), %s604_s18, 2 }
  0x1f   : > { %s129_s28 = scalar_lea.sflag (!%p123_p4), [#allocation3], %s604_s18  ;;  %s132_s20 = scalar_lea.vmem (!%p123_p4), [#allocation2], %s287_s24 }
  0x23   : > { %465 = dma.done.wait (%p575_p8), %s129_s28, 64  }
  0x24   : > { %467 = vsyncadd (%p575_p8), %s129_s28, 4294967232  ;;  %v152_v0 = vld [vmem:[%s132_s20] sm:$0xf]  ;;  %vm154_vm0 = vcmask 1043456   ;;  %s290_s26 = sshll.u32 %s490_s10, 1  ;;  %s151_s10 = scalar_lea.vmem [#allocation5], %s287_s24 }
  0x25   : > { %v153_v1 = vmul.f32 %v152_v0, %v152_v0  ;;  %s187_s21 = sadd.s32 %s486_s9, %s290_s26  ;;  %s191_s4 = sshll.u32 %s151_s10, 4  ;;  %s192_s4 = int_to_ptr.vmem [resolvable:$true] %s191_s4 }
  0x26   : > { %s291_s29 = sshll.u32 %s187_s21, 2  ;;  %s177_s9 = scalar_lea.sflag [#allocation4], %s604_s18 }
  0x27   : > { %v155_v2 = vsel %vm154_vm0, %v153_v1, 0.0  ;;  %s189_s3 = scalar_lea.hbm %s661_s1, %s291_s29  ;;  %s424_s28 = scalar_lea.hbm %s661_s1, 16 }
  0x28   : > { %v156_v3 = vrot.slane %v155_v2, 4  ;;  %s193_s5 = sshll.u32 %s189_s3, 4  ;;  %s194_s5 = int_to_ptr.hbm [resolvable:$true] %s193_s5 }
  0x29   : > { %s418_s14 = sshra.s32 %s194_s5, 4  ;;  %s419_s14 = int_to_ptr.hbm [resolvable:$true] %s418_s14 }
  0x2a   : > { %v157_v4 = vadd.f32 %v156_v3, %v155_v2  ;;  %s420_s15 = scalar_lea.hbm %s419_s14, 4  ;;  %p425_p7 = scmp.lt.s32.totalorder %s419_s14, %s661_s1 }
  0x2b   : > { %p421_p3 = scmp.ne.s32.totalorder %s419_s14, %s420_s15  ;;  %p426_p8 = scmp.lt.s32.totalorder %s424_s28, %s420_s15 }
  0x2c   : > { %v158_v5 = vrot.slane %v157_v4, 2 }
  0x2d   : > { %p422_p5 = pnand %p421_p3, %p579_p9  ;;  %p427_p10 = por %p426_p8, %p425_p7 }
  0x2e   : > { %v159_v6 = vadd.f32 %v158_v5, %v157_v4 }
  0x2f   : > { %p423_p6 = pneg %p422_p5 }
  0x30   : > { %v160_v7 = vrot.slane %v159_v6, 1 }
  0x31   : > { %p428_p11 = pnand %p427_p10, %p423_p6 }
  0x32   : > { %v161_v8 = vadd.f32 %v160_v7, %v159_v6 }
  0x34   : > { %v162_v9 = vmax.f32 %v161_v8, 1e-08 }
  0x36   : > { %372 = vrsqrt.f32 %v162_v9  ;;  %vm169_vm1 = vweird.f32 %v162_v9 }
  0x3c   : > { %v373_v10 = vpop.eup %372 }
  0x3d   : > { %v164_v11 = vmul.f32 %v373_v10, %v162_v9  ;;  %vm170_vm2 = vweird.f32 %v373_v10 }
  0x3e   : > { %vm171_vm3 = vmor %vm169_vm1, %vm170_vm2 }
  0x3f   : > { %v165_v12 = vmul.f32 %v373_v10, %v164_v11 }
  0x41   : > { %v166_v13 = vmul.f32 0.5, %v165_v12 }
  0x43   : > { %v167_v14 = vsub.f32 1.5, %v166_v13 }
  0x45   : > { %v168_v15 = vmul.f32 %v373_v10, %v167_v14 }
  0x47   : > { %v172_v16 = vsel %vm171_vm3, %v373_v10, %v168_v15 }
  0x48   : > { %v173_v17 = vmul.f32 2.0, %v172_v16 }
  0x4a   : > { %v174_v18 = vmul.f32 %v173_v17, %v152_v0 }
  0x4c   : > { %175 = vst [vmem:[%s151_s10] sm:$0xf] %v174_v18 }
  0x4d   : > { %431 = shalt.err (!%p428_p11)
}
  0x4e   : > { %296 = dma.vmem_to_hbm [thread:$0]  (%p579_p9), %s192_s4, 64, %s194_s5, %s177_s9  }
  0x4f PF: > { %p307_p13 = scmp.ge.s32.totalorder %s502_s13, 2  ;;  %s205_s18 = sand.u32 1, %s474_s6  }
  0x50   : > { %s206_s26 = scalar_lea.sflag [#allocation4], %s205_s18 }
  0x51   : > { %p303_p0 = pnand %p307_p13, %p585_p12 }
  0x53   : > { %p304_p1 = pneg %p303_p0 }
  0x55   : > { %469 = dma.done.wait (%p304_p1), %s206_s26, 64  }
  0x56   : > { %471 = vsyncadd (%p304_p1), %s206_s26, 4294967232  ;;  %s17_s13 = sadd.s32 1, %s502_s13   ;;  %s666_s6 = smov %s478_s7 }
  0x57   : > { %p14_p2 = scmp.ge.s32.totalorder %s17_s13, 6   ;;  %s667_s7 = smov %s482_s8 }
  0x58   : > { %s668_s8 = smov %s592_s27  ;;  %s669_s9 = smov %s494_s11 }
  0x59   : > { %s670_s10 = smov %s498_s12  ;;  %s671_s11 = smov %s674_s16 }
  0x5a   : > { %s672_s12 = smov %s678_s17  ;;  %16 = sbr.rel (!%p14_p2) target bundleno = 7 (0x7), region = 69 }
  0x5f   :  { %212 = vsyncpa [#allocation3], 1 }
  0x60   :  { %214 = vsyncpa [#allocation3 + $0x1], 1 }
  0x61   :  { %215 = vsyncpa [#allocation4], 1 }
  0x62   :  { %217 = vsyncpa [#allocation4 + $0x1], 1 }

</bundles_post_ra>
